<compile_context>
chip_gen: v6e
topology: v6e:2x2x1
jax: 0.10.0
libtpu: 0.0.40
codegen_flags: <defaults>
</compile_context>

<pallas_src>
import jax
import jax.numpy as jnp
from jax import lax
from jax.experimental import pallas as pl
from jax.experimental.pallas import tpu as pltpu


def _round_up(a: int, b: int) -> int:
    return ((a + b - 1) // b) * b


def _make_termination_kernel(inv_n: float):
    """inv_n is 1/true_N (static), folded into the finalize step."""

    def kernel(x_ref, w_ref, b_ref, o_ref, acc_ref):
        r = pl.program_id(0)

        # Zero the f32 sum accumulator on the first grid step.
        @pl.when(r == 0)
        def _init():
            acc_ref[...] = jnp.zeros_like(acc_ref)

        # Hot loop: one f32 row-sum per tile (zero-padded rows contribute 0).
        acc_ref[...] += jnp.sum(
            x_ref[...].astype(jnp.float32), axis=0, keepdims=True
        )  # (1, in_dim)

        # Finalize: scale by 1/N, matvec against W (PyTorch layout, no .T),
        # add bias, store the single observable output row.
        @pl.when(r == pl.num_programs(0) - 1)
        def _finalize():
            mean = acc_ref[...] * inv_n                      # (1, in_dim) f32
            y = lax.dot_general(
                mean,
                w_ref[...].astype(jnp.float32),              # (out_dim, in_dim)
                dimension_numbers=(((1,), (1,)), ((), ())),  # contract in_dim
                preferred_element_type=jnp.float32,
            )                                                # (1, out_dim)
            o_ref[...] = (y + b_ref[...].astype(jnp.float32)).astype(o_ref.dtype)

    return kernel


def termination_forward(x, weight, bias, *, tile_rows=None):
    """x: (N, in_dim), weight: (out_dim, in_dim), bias: (out_dim,) -> (out_dim,)."""
    n, in_dim = x.shape
    out_dim, w_in = weight.shape
    assert w_in == in_dim, "weight/in_dim mismatch"

    x_itemsize = jnp.dtype(x.dtype).itemsize
    w_itemsize = jnp.dtype(weight.dtype).itemsize

    # --- choose a row tile: 512-row tiles hit ~85% of HBM roofline; keep each
    # x block <= ~8 MiB so double-buffering fits v7x's smaller VMEM as well.
    if tile_rows is None:
        bytes_per_row = max(in_dim * x_itemsize, 1)
        rows_8mib = max(8, ((8 << 20) // bytes_per_row) // 8 * 8)
        tile_rows = min(512, _round_up(n, 8), rows_8mib)
    tile_rows = max(8, _round_up(int(tile_rows), 8))

    # --- zero-pad rows to a tile multiple (padding adds 0 to the sums; we
    # divide by the true N, so semantics are exact).
    n_pad = _round_up(n, tile_rows)
    if n_pad != n:
        x = jnp.pad(x, ((0, n_pad - n), (0, 0)))
    grid = (n_pad // tile_rows,)

    bias2d = bias.reshape(1, out_dim)
    inv_n = 1.0 / float(n)

    # --- VMEM budget: double-buffered x tiles + resident W/bias/out + acc.
    needed = (
        2 * tile_rows * in_dim * x_itemsize   # x double buffer
        + 2 * out_dim * in_dim * w_itemsize   # weight (conservatively 2x)
        + 4 * out_dim * 4                     # bias + output
        + in_dim * 4                          # f32 accumulator
        + (1 << 20)                           # slack
    )
    vmem_limit = int(min(max(2 * needed, 16 << 20), 48 << 20))  # v7x-safe cap

    cost = pl.CostEstimate(
        flops=2 * n_pad * in_dim + 2 * in_dim * out_dim,
        transcendentals=0,
        bytes_accessed=(
            n_pad * in_dim * x_itemsize
            + out_dim * in_dim * w_itemsize
            + out_dim * 4 * 2
        ),
    )

    kernel = _make_termination_kernel(inv_n)

    out = pl.pallas_call(
        kernel,
        out_shape=jax.ShapeDtypeStruct((1, out_dim), jnp.float32),
        grid_spec=pltpu.PrefetchScalarGridSpec(
            num_scalar_prefetch=0,
            grid=grid,
            in_specs=[
                # x: streamed row tiles
                pl.BlockSpec((tile_rows, in_dim), lambda r: (r, 0)),
                # W / bias: constant block index -> resident across the grid
                pl.BlockSpec((out_dim, in_dim), lambda r: (0, 0)),
                pl.BlockSpec((1, out_dim), lambda r: (0, 0)),
            ],
            out_specs=pl.BlockSpec((1, out_dim), lambda r: (0, 0)),
            scratch_shapes=[pltpu.VMEM((1, in_dim), jnp.float32)],
        ),
        compiler_params=pltpu.CompilerParams(
            dimension_semantics=("arbitrary",),  # carried accumulator -> serial
            vmem_limit_bytes=vmem_limit,
        ),
        cost_estimate=cost,
    )(x, weight, bias2d)
    return out[0]
    # TODO(synk): for production-sized tiny in_dim/out_dim (32/16), batch many
    # Termination heads into one pallas_call to fill the 128-lane axis; a
    # single head is pure launch + DMA overhead at these widths.


if __name__ == "__main__":
    key = jax.random.PRNGKey(0)
    k_x, k_w, k_b = jax.random.split(key, 3)

    N, IN_DIM, OUT_DIM = 24, 32, 16

    x = jax.random.normal(k_x, (N, IN_DIM), dtype=jnp.float32)

    # Deterministic nn.Linear-style init: U(-1/sqrt(in_dim), 1/sqrt(in_dim))
    bound = 1.0 / (IN_DIM ** 0.5)
    weight = jax.random.uniform(k_w, (OUT_DIM, IN_DIM), jnp.float32, -bound, bound)
    bias = jax.random.uniform(k_b, (OUT_DIM,), jnp.float32, -bound, bound)

    # Reference (pure JAX reproduction of the PyTorch forward)
    mean = jnp.mean(x, axis=0)
    full = jnp.concatenate([x, mean[None, :]], axis=0)
    ref = (full @ weight.T + bias)[-1]

    # 1) multi-step grid path (tile_rows=8 -> 3 grid steps, exercises the
    #    accumulator init/finalize logic)
    out = termination_forward(x, weight, bias, tile_rows=8)
    jax.block_until_ready(out)
    assert jnp.allclose(out, ref, atol=1e-5, rtol=1e-5), "tiled mismatch vs reference"

    # 2) auto tile selection (single-block path)
    out2 = termination_forward(x, weight, bias)
    jax.block_until_ready(out2)
    assert jnp.allclose(out2, ref, atol=1e-5, rtol=1e-5), "auto-tile mismatch vs reference"

    print("KERNEL_OK")
</pallas_src>

<mosaic_0001>
module attributes {stable_mosaic.version = 11 : i64} {
  func.func @kernel(%arg0: i32, %arg1: memref<8x32xf32, #tpu.memory_space<vmem>>, %arg2: memref<16x32xf32, #tpu.memory_space<vmem>>, %arg3: memref<1x16xf32, #tpu.memory_space<vmem>>, %arg4: memref<1x16xf32, #tpu.memory_space<vmem>>, %arg5: memref<1x32xf32, #tpu.memory_space<vmem>>) attributes {dimension_semantics = [#tpu.dimension_semantics<arbitrary>], iteration_bounds = array<i64: 3>, scalar_prefetch = 0 : i64, scratch_operands = 1 : i64, tpu.core_type = #tpu.core_type<tc>, window_params = [{transform_indices = @transform_0, window_bounds = array<i64: 8, 32>}, {pipeline_mode = #tpu.pipeline_mode<synchronous>, transform_indices = @transform_1, window_bounds = array<i64: 16, 32>}, {pipeline_mode = #tpu.pipeline_mode<synchronous>, transform_indices = @transform_2, window_bounds = array<i64: 1, 16>}, {pipeline_mode = #tpu.pipeline_mode<synchronous>, transform_indices = @transform_3, window_bounds = array<i64: 1, 16>}]} {
    %c0_i32 = arith.constant 0 : i32
    %0 = arith.cmpi eq, %arg0, %c0_i32 : i32
    %1 = arith.extui %0 : i1 to i32
    %c0_i32_0 = arith.constant 0 : i32
    %2 = arith.cmpi ne, %1, %c0_i32_0 : i32
    scf.if %2 {
      %cst_7 = arith.constant 0.000000e+00 : f32
      %12 = vector.broadcast %cst_7 : f32 to vector<1x32xf32>
      %c0_8 = arith.constant 0 : index
      %c0_9 = arith.constant 0 : index
      %13 = vector.load %arg5[%c0_8, %c0_9] : memref<1x32xf32, #tpu.memory_space<vmem>>, vector<1x32xf32>
      tpu.vector_store %arg5[%c0_8, %c0_9], %12 {strides = array<i32>} : memref<1x32xf32, #tpu.memory_space<vmem>>, vector<1x32xf32>,
    } else {
    }
    %c0 = arith.constant 0 : index
    %c0_1 = arith.constant 0 : index
    %3 = vector.load %arg5[%c0, %c0_1] : memref<1x32xf32, #tpu.memory_space<vmem>>, vector<1x32xf32>
    %c0_2 = arith.constant 0 : index
    %c0_3 = arith.constant 0 : index
    %4 = vector.load %arg1[%c0_2, %c0_3] : memref<8x32xf32, #tpu.memory_space<vmem>>, vector<8x32xf32>
    %cst = arith.constant dense<0.000000e+00> : vector<32xf32>
    %5 = vector.multi_reduction <add>, %4, %cst [0] : vector<8x32xf32> to vector<32xf32>
    %6 = vector.shape_cast %5 : vector<32xf32> to vector<1x32xf32>
    %7 = arith.addf %3, %6 : vector<1x32xf32>
    %c0_4 = arith.constant 0 : index
    %c0_5 = arith.constant 0 : index
    %8 = vector.load %arg5[%c0_4, %c0_5] : memref<1x32xf32, #tpu.memory_space<vmem>>, vector<1x32xf32>
    tpu.vector_store %arg5[%c0_4, %c0_5], %7 {strides = array<i32>} : memref<1x32xf32, #tpu.memory_space<vmem>>, vector<1x32xf32>,
    %c2_i32 = arith.constant 2 : i32
    %9 = arith.cmpi eq, %arg0, %c2_i32 : i32
    %10 = arith.extui %9 : i1 to i32
    %c0_i32_6 = arith.constant 0 : i32
    %11 = arith.cmpi ne, %10, %c0_i32_6 : i32
    scf.if %11 {
      %c0_7 = arith.constant 0 : index
      %c0_8 = arith.constant 0 : index
      %12 = vector.load %arg5[%c0_7, %c0_8] : memref<1x32xf32, #tpu.memory_space<vmem>>, vector<1x32xf32>
      %cst_9 = arith.constant 0.0416666679 : f32
      %13 = vector.broadcast %cst_9 : f32 to vector<1x32xf32>
      %14 = arith.mulf %12, %13 : vector<1x32xf32>
      %c0_10 = arith.constant 0 : index
      %c0_11 = arith.constant 0 : index
      %15 = vector.load %arg2[%c0_10, %c0_11] : memref<16x32xf32, #tpu.memory_space<vmem>>, vector<16x32xf32>
      %cst_12 = arith.constant dense<0.000000e+00> : vector<1x16xf32>
      %16 = tpu.matmul %14, %15, %cst_12 {dimension_numbers = #tpu.dot_dimension_numbers<[1], [1], [0], [0], [0, 0, 1, 0], [], []>} : vector<1x32xf32>, vector<16x32xf32>, vector<1x16xf32> -> vector<1x16xf32>
      %c0_13 = arith.constant 0 : index
      %c0_14 = arith.constant 0 : index
      %17 = vector.load %arg3[%c0_13, %c0_14] : memref<1x16xf32, #tpu.memory_space<vmem>>, vector<1x16xf32>
      %18 = arith.addf %16, %17 : vector<1x16xf32>
      %c0_15 = arith.constant 0 : index
      %c0_16 = arith.constant 0 : index
      %19 = vector.load %arg4[%c0_15, %c0_16] : memref<1x16xf32, #tpu.memory_space<vmem>>, vector<1x16xf32>
      tpu.vector_store %arg4[%c0_15, %c0_16], %18 {strides = array<i32>} : memref<1x16xf32, #tpu.memory_space<vmem>>, vector<1x16xf32>,
    } else {
    }
    return
  }
  func.func @transform_0(%arg0: i32) -> (i32, i32) {
    %c0_i32 = arith.constant 0 : i32
    %c0_i32_0 = arith.constant 0 : i32
    return %arg0, %c0_i32 : i32, i32
  }
  func.func @transform_1(%arg0: i32) -> (i32, i32) {
    %c0_i32 = arith.constant 0 : i32
    %c0_i32_0 = arith.constant 0 : i32
    %c0_i32_1 = arith.constant 0 : i32
    return %c0_i32, %c0_i32_0 : i32, i32
  }
  func.func @transform_2(%arg0: i32) -> (i32, i32) {
    %c0_i32 = arith.constant 0 : i32
    %c0_i32_0 = arith.constant 0 : i32
    %c0_i32_1 = arith.constant 0 : i32
    return %c0_i32, %c0_i32_0 : i32, i32
  }
  func.func @transform_3(%arg0: i32) -> (i32, i32) {
    %c0_i32 = arith.constant 0 : i32
    %c0_i32_0 = arith.constant 0 : i32
    %c0_i32_1 = arith.constant 0 : i32
    return %c0_i32, %c0_i32_0 : i32, i32
  }
}

</mosaic_0001>

<bundles_post_ra>
// kernel: tpu_custom_call.1
= control target key start
LH: loop header
LB: loop body
LE: loop exit
PB: predicated region body
PF: predicated region fallthrough
CT: control target
= control target key end

     0   :  { %8 = vsyncpa [#allocation4], 0  ;;  %s740_s0 = inlined_call_operand.hbm [shape: f32[24,32], index: 0, kind: input, shape index: {}]   ;;  %s741_s1 = inlined_call_operand.hbm [shape: f32[16,32], index: 1, kind: input, shape index: {}]   ;;  %s742_s2 = inlined_call_operand.vmem [shape: f32[1,16], index: 2, kind: input, shape index: {}]   ;;  %s743_s3 = inlined_call_operand.hbm [shape: f32[1,16], index: 3, kind: output, shape index: {}]  }
   0x1   :  { %10 = vsyncpa [#allocation4 + $0x1], 0 }
   0x2   :  { %11 = vsyncpa [#allocation7], 0 }
   0x3   :  { %12 = vsyncpa [#allocation5], 0  ;;  %s605_s12 = smov 0   ;;  %s607_s13 = smov 0  }
   0x4   :  { %s609_s14 = smov 0   ;;  %s611_s15 = smov 0  }
   0x5 LB: > { %s624_s16 = sadd.s32 4294967295, %s575_s15   ;;  %p38_p0 = scmp.ne.s32.totalorder %s567_s13, %s563_s12  ;;  %s575_s15 = sphi %s611_s15, %s759_s15   ;;  %s571_s14 = sphi %s609_s14, %s758_s14   ;;  %s567_s13 = sphi %s607_s13, %s757_s13   ;;  %s563_s12 = sphi %s605_s12, %s756_s12  }
   0x6   : > { %p744_p1 = scmp.eq.s32.totalorder %s624_s16, 0  ;;  %p366_p2 = scmp.ge.s32.totalorder %s575_s15, 1 }
   0x7   : > { %p112_p3 = scmp.lt.s32.totalorder %s575_s15, 4  ;;  %s577_s19 = smov [#allocation6]  }
   0x8   : > { %p633_p5 = por %p744_p1, %p38_p0  ;;  %s124_s20 = sshll.u32 %s577_s19, 4  ;;  %s125_s20 = int_to_ptr.vmem [resolvable:$true] %s124_s20 }
   0x9   : > { %p637_p6 = pnand %p366_p2, %p112_p3  ;;  %s650_s22 = sadd.s32 1, %s575_s15  }
   0xa   : > { %s747_s17 = scalar_select %p633_p5, 1, 0 }
   0xb   : > { %s748_s18 = scalar_select %p637_p6, 1, 0 }
   0xc   : > { %p403_p7 = pneg %p637_p6  ;;  %s25_s23 = sadd.s32 1, %s571_s14 }
   0xd   : > { %s22_s24 = ssub.s32 %s575_s15, %s650_s22  ;;  %s466_s25 = scalar_lea.vmem %s125_s20, 256 }
   0xe   : > { %p645_p8 = pnand %p403_p7, %p744_p1  ;;  %p467_p10 = scmp.ne.s32.totalorder %s125_s20, %s466_s25 }
   0xf   : > { %p474_p13 = scmp.lt.s32.totalorder %s125_s20, %s125_s20  ;;  %p475_p0 = scmp.lt.s32.totalorder %s466_s25, %s466_s25 }
  0x10   : > { %p457_p9 = pneg %p645_p8 }
  0x11   : > { %p476_p2 = por %p475_p0, %p474_p13 }
  0x12   : > { %p469_p11 = pnand %p467_p10, %p457_p9 }
  0x14   : > { %p470_p12 = pneg %p469_p11 }
  0x16   : > { %p477_p3 = pnand %p476_p2, %p470_p12 }
  0x18   : > { %480 = shalt.err (!%p477_p3)
}
  0x19   : > { %s578_s26 = smov 128   ;;  %s579_s27 = smov 8  }
  0x1a   : > { %406 = dma.hbm_to_vmem [thread:$0]  (!%p645_p8), %s741_s1, 256, %s125_s20, [#allocation7], %s578_s26, %s578_s26, %s579_s27  }
  0x1b   : > { %p23_p7 = scmp.eq.s32.totalorder %s22_s24, 0  ;;  %p32_p9 = scmp.ne.s32.totalorder %s571_s14, %s567_s13 }
  0x1c   : > { %p33_p10 = scmp.eq.s32.totalorder %s575_s15, 0  ;;  %p412_p11 = scmp.lt.s32.totalorder %s575_s15, 3 }
  0x1d   : > { %s667_s30 = scalar_select %p23_p7, %s571_s14, %s25_s23  }
  0x1e   : > { %p34_p12 = por %p33_p10, %p32_p9  ;;  %s141_s4 = sand.u32 1, %s571_s14  }
  0x1f   : > { %s369_s5 = sshll.u32 %s141_s4, 3  ;;  %s370_s6 = sshll.u32 %s575_s15, 7 }
  0x20   : > { %s674_s9 = scalar_lea.hbm %s740_s0, %s370_s6  ;;  %s145_s10 = scalar_lea.vmem [#allocation3], %s369_s5 }
  0x21   : > { %s152_s11 = sshll.u32 %s145_s10, 4  ;;  %p676_p8 = pnand %p412_p11, %p34_p12  ;;  %s153_s11 = int_to_ptr.vmem [resolvable:$true] %s152_s11 }
  0x22   : > { %s142_s19 = scalar_lea.sflag [#allocation4], %s141_s4  ;;  %s481_s20 = scalar_lea.hbm %s674_s9, 128 }
  0x23   : > { %p482_p13 = scmp.ne.s32.totalorder %s674_s9, %s481_s20  ;;  %p483_p0 = pneg %p676_p8 }
  0x24   : > { %s486_s23 = scalar_lea.hbm %s740_s0, 384  ;;  %p487_p7 = scmp.lt.s32.totalorder %s674_s9, %s740_s0 }
  0x25   : > { %p484_p2 = pnand %p483_p0, %p482_p13  ;;  %p488_p9 = scmp.lt.s32.totalorder %s486_s23, %s481_s20 }
  0x27   : > { %p485_p3 = pneg %p484_p2  ;;  %p489_p10 = por %p488_p9, %p487_p7 }
  0x29   : > { %p490_p11 = pnand %p489_p10, %p485_p3 }
  0x2b   : > { %493 = shalt.err (!%p490_p11)
}
  0x2c   : > { %s494_s26 = scalar_lea.vmem %s153_s11, 128  ;;  %s580_s27 = smov [#allocation3]  }
  0x2d   : > { %p495_p12 = scmp.ne.s32.totalorder %s153_s11, %s494_s26  ;;  %s499_s28 = sshll.u32 %s580_s27, 4  ;;  %s500_s28 = int_to_ptr.vmem [resolvable:$false] %s499_s28 }
  0x2e   : > { %s501_s29 = scalar_lea.vmem %s500_s28, 256  ;;  %p502_p13 = scmp.lt.s32.totalorder %s153_s11, %s500_s28 }
  0x2f   : > { %p497_p4 = pnand %p495_p12, %p483_p0  ;;  %p503_p2 = scmp.lt.s32.totalorder %s501_s29, %s494_s26 }
  0x31   : > { %p498_p1 = pneg %p497_p4  ;;  %p504_p5 = por %p503_p2, %p502_p13 }
  0x33   : > { %p505_p6 = pnand %p504_p5, %p498_p1 }
  0x35   : > { %508 = shalt.err (!%p505_p6)
}
  0x36   : > { %410 = dma.hbm_to_vmem [thread:$0]  (!%p676_p8), %s674_s9, 128, %s153_s11, %s142_s19  }
  0x37   : > { %p751_p3 = scmp.ne.s32.totalorder %s748_s18, 0 }
  0x38   : > { %s163_s4 = sand.u32 (!%p751_p3), 1, %s567_s13   ;;  %p752_p4 = scmp.ne.s32.totalorder (!%p751_p3), %s747_s17, 0 }
  0x39   : > { %161 = sbr.rel (%p751_p3) target bundleno = 312 (0x138), region = 32  ;;  %s372_s5 = sshll.u32 (!%p751_p3), %s163_s4, 3 }
  0x3a   : > { %s164_s6 = scalar_lea.sflag (!%p751_p3), [#allocation4], %s163_s4  ;;  %s167_s7 = scalar_lea.vmem (!%p751_p3), [#allocation3], %s372_s5 }
  0x3e   : > { %550 = dma.done.wait (%p752_p4), %s164_s6, 128  }
  0x3f   : > { %552 = vsyncadd (%p752_p4), %s164_s6, 4294967168  ;;  %p753_p1 = scmp.eq.s32.totalorder %s624_s16, 0 }
  0x41   : > { %554 = dma.done.wait (%p753_p1), [#allocation7], 256   ;;  %p754_p5 = pmov %p753_p1 }
  0x42   : > { %p755_p6 = scmp.ne.s32.totalorder %s624_s16, 0 }
  0x43   : > { %556 = vsyncadd (%p754_p5), [#allocation7], 4294967040 }
  0x44   : > { %192 = sbr.rel (%p755_p6) target bundleno = 75 (0x4b), region = 44 }
  0x49   : > { %vm193_vm0 = vcmask 253952   ;;  %v581_v0 = vmov 0.0  }
  0x4a   : > { %194 = vst.msk [vmem:[#allocation2] sm:$0x1] %vm193_vm0, %v581_v0 }
  0x4b PF: > { %v196_v1 = vld [vmem:[%s167_s7] sm:$0xff]  ;;  %vm197_vm1 = vcmask 261120   ;;  %vm206_vm2 = vcmask 253952   ;;  %p375_p8 = scmp.ne.s32.totalorder %s624_s16, 2 }
  0x4c   : > { %v198_v2 = vsel %vm197_vm1, %v196_v1, 0.0 }
  0x4d   : > { %v199_v3 = vrot.slane %v198_v2, 4 }
  0x4f   : > { %v200_v4 = vadd.f32 %v199_v3, %v198_v2 }
  0x51   : > { %v201_v5 = vrot.slane %v200_v4, 2  ;;  %v195_v8 = vld [vmem:[#allocation2] sm:$0x1] }
  0x53   : > { %v202_v6 = vadd.f32 %v201_v5, %v200_v4 }
  0x55   : > { %v203_v7 = vrot.slane %v202_v6, 1 }
  0x57   : > { %v204_v9 = vadd.f32 %v203_v7, %v202_v6  ;;  %211 = sbr.rel (%p375_p8) target bundleno = 297 (0x129), region = 48 }
  0x59   : > { %v205_v10 = vadd.f32 %v204_v9, %v195_v8 }
  0x5b   : > { %207 = vst.msk [vmem:[#allocation2] sm:$0x1] %vm206_vm2, %v205_v10 }
  0x5c   : > { %v215_v11 = vld [vmem:[#allocation6 + $0x8] sm:$0xff]  ;;  %v582_v12 = vmov 0.0   ;;  %vm583_vm3 = vmmov 0   ;;  %v214_v14 = vld [vmem:[#allocation6] sm:$0xff]  ;;  %vm296_vm4 = vcmask 122880  }
  0x5d   : > { %386 = vmatprep.subr.mxu0 %v582_v12  ;;  %390 = vmatprep.mubr.msk.f32.mxu0 %vm583_vm3, %v582_v12  ;;  %v216_v16 = vld [vmem:[%s742_s2] sm:$0x1] }
  0x5e   : > { %387 = vmatpush3.xpose.msk.msra.mxu0 %vm197_vm1, %v215_v11 }
  0x5f   : > { %388 = vmatprep.subr.mxu0 %v582_v12 }
  0x62   : > { %v212_v13 = vld [vmem:[#allocation2] sm:$0x1]  ;;  %389 = vmatpush3.xpose.msk.msra.mxu0 %vm197_vm1, %v214_v14 }
  0x63   : > { %v213_v15 = vmul.f32 0.041666668, %v212_v13 }
  0x65   : > { %391 = vmatmul.mubr.msk.f32.vlgmr.msra.gmra.mxu0 %vm197_vm1, %v213_v15 }
 0x125   : > { %v292_v17 = vpop.f32.mrf.mxu0 }
 0x126   : > { %v293_v18 = vadd.f32 %v292_v17, %v216_v16 }
 0x127   : > { %v392_v19 = vpop.f32.mrf.mxu0 }
 0x128   : > { %297 = vst.msk [vmem:[#allocation8] sm:$0x1] %vm296_vm4, %v293_v18 }
 0x129 PF: > { %p414_p0 = scmp.eq.s32.totalorder %s624_s16, 2  ;;  %s584_s8 = smov [#allocation8]  }
 0x12a   : > { %s305_s9 = sshll.u32 %s584_s8, 4  ;;  %s306_s9 = int_to_ptr.vmem [resolvable:$true] %s305_s9 }
 0x12b   : > { %s509_s10 = scalar_lea.vmem %s306_s9, 16  ;;  %s515_s11 = scalar_lea.vmem %s306_s9, 32 }
 0x12c   : > { %p510_p7 = scmp.ne.s32.totalorder %s306_s9, %s509_s10  ;;  %p516_p11 = scmp.lt.s32.totalorder %s306_s9, %s306_s9 }
 0x12d   : > { %p517_p12 = scmp.lt.s32.totalorder %s515_s11, %s509_s10 }
 0x12e   : > { %p511_p9 = pnand %p510_p7, %p414_p0 }
 0x12f   : > { %p518_p13 = por %p517_p12, %p516_p11 }
 0x130   : > { %p512_p10 = pneg %p511_p9 }
 0x132   : > { %p519_p2 = pnand %p518_p13, %p512_p10 }
 0x134   : > { %522 = shalt.err (!%p519_p2)
}
 0x135   : > { %400 = dma.vmem_to_hbm [thread:$0]  (%p414_p0), %s306_s9, 16, %s743_s3, [#allocation5]  }
 0x136   : > { %558 = dma.done.wait (%p414_p0), [#allocation5], 16  }
 0x137   : > { %560 = vsyncadd (%p414_p0), [#allocation5], 4294967280 }
 0x138 PF: > { %p15_p3 = scmp.ge.s32.totalorder %s650_s22, 5   ;;  %s756_s12 = smov %s567_s13 }
 0x139   : > { %s757_s13 = smov %s571_s14  ;;  %s758_s14 = smov %s667_s30 }
 0x13a   : > { %s759_s15 = smov %s650_s22  ;;  %17 = sbr.rel (!%p15_p3) target bundleno = 5 (0x5), region = 81 }
 0x13f   :  { %318 = vsyncpa [#allocation4], 1 }
 0x140   :  { %320 = vsyncpa [#allocation4 + $0x1], 1 }
 0x141   :  { %321 = vsyncpa [#allocation7], 1 }
 0x142   :  { %322 = vsyncpa [#allocation5], 1 }
 0x143   :  { %324 = vsyncpa [#allocation5 + $0x1], 1 }

</bundles_post_ra>
